<compile_context>
chip_gen: v6e
topology: v6e:2x2x1
jax: 0.10.0
libtpu: 0.0.40
codegen_flags: <defaults>
</compile_context>

<pallas_src>
import math

import jax
import jax.numpy as jnp
from jax.experimental import pallas as pl
from jax.experimental.pallas import tpu as pltpu


def temporal_decay_kernel(d_ref, wt_ref, b_ref, out_ref):
    # MXU matmul on (possibly bf16) operands with f32 accumulation.
    z = jnp.dot(d_ref[...], wt_ref[...], preferred_element_type=jnp.float32)
    z = z + b_ref[...]                       # (TB, H) + (1, H), f32
    gamma = jnp.exp(-jnp.maximum(z, 0.0))    # relu + exp(-x) in f32 (VPU/EUP)
    out_ref[...] = gamma.astype(out_ref.dtype)


def _round_up(x, m):
    return (x + m - 1) // m * m


def temporal_decay(d, wt, b, *, block_b=512, compute_dtype=jnp.bfloat16):
    """Forward pass of BRITS TemporalDecay.

    d:  (B, D_in) float32   time-delta matrix
    wt: (D_in, H) float32   weight stored pre-transposed (W.T, done once at init)
    b:  (H,)      float32   bias
    returns gamma: (B, H) float32
    """
    B, D_in = d.shape
    H = wt.shape[1]
    out_dtype = d.dtype

    # Batch tile: largest multiple of 8 <= block_b that covers B.
    tb = min(block_b, _round_up(B, 8))
    padded_b = _round_up(B, tb)
    if padded_b != B:
        # Padded rows produce exp(-relu(b)) (finite) and are sliced off below.
        d = jnp.pad(d, ((0, padded_b - B), (0, 0)))

    # Narrow the bandwidth-bound operands; keep bias / epilogue in f32.
    d_c = d.astype(compute_dtype)
    wt_c = wt.astype(compute_dtype)
    b2 = b.reshape(1, H).astype(jnp.float32)

    grid = (padded_b // tb,)

    cost = pl.CostEstimate(
        flops=2 * padded_b * D_in * H,
        transcendentals=padded_b * H,
        bytes_accessed=(
            d_c.size * d_c.dtype.itemsize
            + wt_c.size * wt_c.dtype.itemsize
            + b2.size * 4
            + padded_b * H * jnp.dtype(out_dtype).itemsize
        ),
    )

    out = pl.pallas_call(
        temporal_decay_kernel,
        out_shape=jax.ShapeDtypeStruct((padded_b, H), out_dtype),
        grid_spec=pl.GridSpec(
            grid=grid,
            in_specs=[
                # d: one batch tile per grid step (pipelined DMA).
                pl.BlockSpec((tb, D_in), lambda i: (i, 0)),
                # Wt / bias: same block every step -> stays resident in VMEM.
                pl.BlockSpec((D_in, H), lambda i: (0, 0)),
                pl.BlockSpec((1, H), lambda i: (0, 0)),
            ],
            out_specs=pl.BlockSpec((tb, H), lambda i: (i, 0)),
        ),
        compiler_params=pltpu.CompilerParams(
            # Batch rows are independent -> shard across TCs on v7x megacore.
            dimension_semantics=("parallel",),
        ),
        cost_estimate=cost,
    )(d_c, wt_c, b2)

    if padded_b != B:
        out = out[:B]
    return out


if __name__ == "__main__":
    # Small shapes consistent with the module: input_size=32, rnn_hid_size=32.
    # B = batch*timesteps rows; 256 rows exercises the tiled grid (2 tiles of 128).
    B, D_in, H = 256, 32, 32

    key = jax.random.PRNGKey(0)
    k_d, k_w, k_b = jax.random.split(key, 3)

    # reset_parameters(): uniform(-stdv, stdv), stdv = 1/sqrt(rnn_hid_size).
    stdv = 1.0 / math.sqrt(H)
    W = jax.random.uniform(k_w, (H, D_in), jnp.float32, minval=-stdv, maxval=stdv)
    b = jax.random.uniform(k_b, (H,), jnp.float32, minval=-stdv, maxval=stdv)

    # Stored parameter layout: transpose ONCE at init, not per forward call.
    Wt = jnp.asarray(W.T)

    # Time-delta input (non-negative in BRITS).
    d = jax.random.uniform(k_d, (B, D_in), jnp.float32, minval=0.0, maxval=5.0)

    gamma = temporal_decay(d, Wt, b, block_b=128)
    gamma = jax.block_until_ready(gamma)
    assert gamma.shape == (B, H)

    # Reference with matching operand precision (bf16 operands, f32 accumulate).
    z_ref = jnp.dot(
        d.astype(jnp.bfloat16), Wt.astype(jnp.bfloat16),
        preferred_element_type=jnp.float32,
    ) + b
    ref_bf16 = jnp.exp(-jnp.maximum(z_ref, 0.0))
    assert jnp.allclose(gamma, ref_bf16, atol=1e-5, rtol=1e-5)

    # Sanity check vs. the full-f32 PyTorch semantics (loose: bf16 operand rounding).
    ref_f32 = jnp.exp(-jnp.maximum(d @ W.T + b, 0.0))
    assert jnp.allclose(gamma, ref_f32, atol=1e-1, rtol=1e-1)

    print("KERNEL_OK")
</pallas_src>

<mosaic_0001>
module attributes {stable_mosaic.version = 11 : i64} {
  func.func @temporal_decay_kernel(%arg0: i32, %arg1: memref<128x32xbf16, #tpu.memory_space<vmem>>, %arg2: memref<32x32xbf16, #tpu.memory_space<vmem>>, %arg3: memref<1x32xf32, #tpu.memory_space<vmem>>, %arg4: memref<128x32xf32, #tpu.memory_space<vmem>>) attributes {dimension_semantics = [#tpu.dimension_semantics<parallel>], iteration_bounds = array<i64: 2>, scalar_prefetch = 0 : i64, scratch_operands = 0 : i64, tpu.core_type = #tpu.core_type<tc>, window_params = [{transform_indices = @transform_0, window_bounds = array<i64: 128, 32>}, {pipeline_mode = #tpu.pipeline_mode<synchronous>, transform_indices = @transform_1, window_bounds = array<i64: 32, 32>}, {pipeline_mode = #tpu.pipeline_mode<synchronous>, transform_indices = @transform_2, window_bounds = array<i64: 1, 32>}, {transform_indices = @transform_3, window_bounds = array<i64: 128, 32>}]} {
    %c0 = arith.constant 0 : index
    %c0_0 = arith.constant 0 : index
    %0 = vector.load %arg1[%c0, %c0_0] : memref<128x32xbf16, #tpu.memory_space<vmem>>, vector<128x32xbf16>
    %c0_1 = arith.constant 0 : index
    %c0_2 = arith.constant 0 : index
    %1 = vector.load %arg2[%c0_1, %c0_2] : memref<32x32xbf16, #tpu.memory_space<vmem>>, vector<32x32xbf16>
    %cst = arith.constant dense<0.000000e+00> : vector<128x32xf32>
    %2 = tpu.matmul %0, %1, %cst {dimension_numbers = #tpu.dot_dimension_numbers<[1], [0], [0], [1], [0, 0, 1, 1], [], []>} : vector<128x32xbf16>, vector<32x32xbf16>, vector<128x32xf32> -> vector<128x32xf32>
    %c0_3 = arith.constant 0 : index
    %c0_4 = arith.constant 0 : index
    %3 = vector.load %arg3[%c0_3, %c0_4] : memref<1x32xf32, #tpu.memory_space<vmem>>, vector<1x32xf32>
    %4 = vector.broadcast %3 : vector<1x32xf32> to vector<128x32xf32>
    %5 = arith.addf %2, %4 : vector<128x32xf32>
    %cst_5 = arith.constant 0.000000e+00 : f32
    %6 = vector.broadcast %cst_5 : f32 to vector<128x32xf32>
    %7 = arith.maximumf %5, %6 : vector<128x32xf32>
    %cst_6 = arith.constant 0.000000e+00 : f32
    %8 = vector.broadcast %cst_6 : f32 to vector<128x32xf32>
    %9 = arith.subf %8, %7 : vector<128x32xf32>
    %10 = math.exp %9 : vector<128x32xf32>
    %c0_7 = arith.constant 0 : index
    %c0_8 = arith.constant 0 : index
    %11 = vector.load %arg4[%c0_7, %c0_8] : memref<128x32xf32, #tpu.memory_space<vmem>>, vector<128x32xf32>
    tpu.vector_store %arg4[%c0_7, %c0_8], %10 {strides = array<i32>} : memref<128x32xf32, #tpu.memory_space<vmem>>, vector<128x32xf32>,
    return
  }
  func.func @transform_0(%arg0: i32) -> (i32, i32) {
    %c0_i32 = arith.constant 0 : i32
    %c0_i32_0 = arith.constant 0 : i32
    return %arg0, %c0_i32 : i32, i32
  }
  func.func @transform_1(%arg0: i32) -> (i32, i32) {
    %c0_i32 = arith.constant 0 : i32
    %c0_i32_0 = arith.constant 0 : i32
    %c0_i32_1 = arith.constant 0 : i32
    return %c0_i32, %c0_i32_0 : i32, i32
  }
  func.func @transform_2(%arg0: i32) -> (i32, i32) {
    %c0_i32 = arith.constant 0 : i32
    %c0_i32_0 = arith.constant 0 : i32
    %c0_i32_1 = arith.constant 0 : i32
    return %c0_i32, %c0_i32_0 : i32, i32
  }
  func.func @transform_3(%arg0: i32) -> (i32, i32) {
    %c0_i32 = arith.constant 0 : i32
    %c0_i32_0 = arith.constant 0 : i32
    return %arg0, %c0_i32 : i32, i32
  }
}

</mosaic_0001>

<bundles_post_ra>
// kernel: tpu_custom_call.1
= control target key start
LH: loop header
LB: loop body
LE: loop exit
PB: predicated region body
PF: predicated region fallthrough
CT: control target
= control target key end

     0   :  { %s654_s12 = smov 0   ;;  %s744_s0 = inlined_call_operand.vmem [shape: bf16[256,32], index: 0, kind: input, shape index: {}]   ;;  %s745_s1 = inlined_call_operand.vmem [shape: bf16[32,32], index: 1, kind: input, shape index: {}]   ;;  %s746_s2 = inlined_call_operand.vmem [shape: f32[1,32], index: 2, kind: input, shape index: {}]   ;;  %s747_s3 = inlined_call_operand.vmem [shape: f32[256,32], index: 3, kind: output, shape index: {}]  }
   0x1 LB: > { %s512_s13 = sadd.s32 4294967295, %s632_s12   ;;  %p516_p0 = scmp.ge.s32.totalorder %s632_s12, 1  ;;  %s632_s12 = sphi %s654_s12, %s13_s12  }
   0x2   : > { %p138_p1 = scmp.lt.s32.totalorder %s632_s12, 3 }
   0x4   : > { %p139_p2 = pnand %p516_p0, %p138_p1 }
   0x5   : > { %s517_s16 = sshll.u32 (!%p139_p2), %s512_s13, 4 }
   0x6   : > { %142 = sbr.rel (%p139_p2) target bundleno = 253 (0xfd), region = 32  ;;  %p163_p3 = scmp.lt.s32.totalorder (!%p139_p2), %s517_s16, 31 }
   0xb   : > { %v584_v0 = vld [vmem:[%s745_s1 + $0x8] sm:$0xff]   ;;  %v585_v1 = vld [vmem:[%s745_s1] sm:$0xff]   ;;  %s749_s16 = smov (!%p163_p3, %s517_s16), 31  ;;  %vm254_vm0 = vcmask 261120  }
   0xc   : > { %552 = vmatprep.subr.bf16.mxu0 %v584_v0  ;;  %572 = vmatprep.subr.bf16.mxu1 %v584_v0  ;;  %s518_s19 = sshll.u32 %s749_s16, 2  ;;  %v685_v10 = vld [vmem:[%s746_s2] ss:$0 sm:$0xff]  ;;  %s520_s25 = sshll.u32 %s749_s16, 3 }
   0xd   : > { %553 = vmatpush3.bf16.msra.mxu0 %v584_v0  ;;  %574 = vmatpush3.bf16.msra.mxu1 %v584_v0  ;;  %s166_s22 = scalar_lea.vmem %s744_s0, %s518_s19  ;;  %s707_s28 = scalar_lea.vmem %s747_s3, %s520_s25 }
   0xe   : > { %554 = vmatprep.subr.bf16.mxu0 %v585_v1  ;;  %573 = vmatprep.subr.bf16.mxu1 %v585_v1  ;;  %v586_v2 = vld [vmem:[%s166_s22] sm:$0xff]   ;;  %v588_v4 = vld [vmem:[%s166_s22 + $0x8] sm:$0xff]   ;;  %v590_v6 = vld [vmem:[%s166_s22 + $0x10] sm:$0xff]  }
   0xf   : > { %v587_v3 = vld [vmem:[%s166_s22 + $0x20] sm:$0xff]   ;;  %556 = vmatprep.mubr.msk.bf16.mxu0 %vm254_vm0, %v586_v2  ;;  %v589_v5 = vld [vmem:[%s166_s22 + $0x28] sm:$0xff]   ;;  %v591_v7 = vld [vmem:[%s166_s22 + $0x30] sm:$0xff]  }
  0x10   : > { %564 = vmatprep.mubr.msk.bf16.mxu1 %vm254_vm0, %v587_v3  ;;  %v592_v8 = vld [vmem:[%s166_s22 + $0x18] sm:$0xff]  }
  0x11   : > { %555 = vmatpush3.bf16.msra.mxu0 %v585_v1  ;;  %575 = vmatpush3.bf16.msra.mxu1 %v585_v1  ;;  %v593_v9 = vld [vmem:[%s166_s22 + $0x38] sm:$0xff]  }
  0x14   : > { %557 = vmatmul.mubr.msk.bf16.vlgmr.msra.gmra.mxu0 %vm254_vm0, %v588_v4  ;;  %565 = vmatmul.mubr.msk.bf16.vlgmr.msra.gmra.mxu1 %vm254_vm0, %v589_v5 }
  0x15   : > { %560 = vmatprep.mubr.msk.bf16.mxu0 %vm254_vm0, %v590_v6  ;;  %568 = vmatprep.mubr.msk.bf16.mxu1 %vm254_vm0, %v591_v7 }
  0x1c   : > { %561 = vmatmul.mubr.msk.bf16.gmra.mxu0 %vm254_vm0, %v592_v8  ;;  %569 = vmatmul.mubr.msk.bf16.gmra.mxu1 %vm254_vm0, %v593_v9 }
  0xd4   : > { %v558_v11 = vpop.f32.mrf.mxu0  ;;  %v566_v13 = vpop.f32.mrf.mxu1 }
  0xd5   : > { %v322_v12 = vadd.f32 %v558_v11, %v685_v10  ;;  %v354_v14 = vadd.f32 %v566_v13, %v685_v10 }
  0xd6   : > { %v313_v15 = vpop.f32.mrf.mxu0  ;;  %v345_v18 = vpop.f32.mrf.mxu1 }
  0xd7   : > { %v378_v16 = vmax.f32 %v322_v12, 0.0  ;;  %v314_v17 = vadd.f32 %v685_v10, %v313_v15  ;;  %v386_v19 = vmax.f32 %v354_v14, 0.0  ;;  %v346_v20 = vadd.f32 %v685_v10, %v345_v18 }
  0xd8   : > { %v559_v21 = vpop.f32.mrf.mxu0  ;;  %v567_v25 = vpop.f32.mrf.mxu1 }
  0xd9   : > { %v394_v22 = vsub.f32 0.0, %v378_v16  ;;  %v376_v23 = vmax.f32 %v314_v17, 0.0  ;;  %v325_v24 = vadd.f32 %v559_v21, %v685_v10  ;;  %v402_v26 = vsub.f32 0.0, %v386_v19 }
  0xda   : > { %v384_v27 = vmax.f32 %v346_v20, 0.0  ;;  %v357_v28 = vadd.f32 %v567_v25, %v685_v10  ;;  %v316_v29 = vpop.f32.mrf.mxu0  ;;  %v348_v34 = vpop.f32.mrf.mxu1 }
  0xdb   : > { %v412_v30 = vmul.f32 1.442695, %v394_v22  ;;  %v392_v31 = vsub.f32 0.0, %v376_v23  ;;  %v379_v32 = vmax.f32 %v325_v24, 0.0  ;;  %v317_v33 = vadd.f32 %v685_v10, %v316_v29 }
  0xdc   : > { %v428_v35 = vmul.f32 1.442695, %v402_v26  ;;  %v400_v36 = vsub.f32 0.0, %v384_v27  ;;  %v387_v37 = vmax.f32 %v357_v28, 0.0  ;;  %v349_v38 = vadd.f32 %v685_v10, %v348_v34  ;;  %v562_v39 = vpop.f32.mrf.mxu0  ;;  %v570_v43 = vpop.f32.mrf.mxu1 }
  0xdd   : > { %594 = vpow2.f32 %v412_v30  ;;  %v408_v40 = vmul.f32 1.442695, %v392_v31  ;;  %v395_v41 = vsub.f32 0.0, %v379_v32  ;;  %v377_v42 = vmax.f32 %v317_v33, 0.0 }
  0xde   : > { %596 = vpow2.f32 %v428_v35  ;;  %v424_v44 = vmul.f32 1.442695, %v400_v36  ;;  %v403_v45 = vsub.f32 0.0, %v387_v37  ;;  %v385_v46 = vmax.f32 %v349_v38, 0.0  ;;  %v329_v47 = vpop.f32.mrf.mxu0  ;;  %v361_v51 = vpop.f32.mrf.mxu1 }
  0xdf   : > { %598 = vpow2.f32 %v408_v40  ;;  %v414_v48 = vmul.f32 1.442695, %v395_v41  ;;  %v393_v49 = vsub.f32 0.0, %v377_v42  ;;  %v338_v50 = vadd.f32 %v562_v39, %v685_v10 }
  0xe0   : > { %600 = vpow2.f32 %v424_v44  ;;  %v430_v52 = vmul.f32 1.442695, %v403_v45  ;;  %v401_v53 = vsub.f32 0.0, %v385_v46  ;;  %v370_v54 = vadd.f32 %v570_v43, %v685_v10  ;;  %v563_v55 = vpop.f32.mrf.mxu0  ;;  %v571_v59 = vpop.f32.mrf.mxu1 }
  0xe1   : > { %602 = vpow2.f32 %v414_v48  ;;  %v410_v56 = vmul.f32 1.442695, %v393_v49  ;;  %v382_v57 = vmax.f32 %v338_v50, 0.0  ;;  %v330_v58 = vadd.f32 %v685_v10, %v329_v47 }
  0xe2   : > { %604 = vpow2.f32 %v430_v52  ;;  %v426_v60 = vmul.f32 1.442695, %v401_v53  ;;  %v390_v61 = vmax.f32 %v370_v54, 0.0  ;;  %v362_v62 = vadd.f32 %v685_v10, %v361_v51  ;;  %v332_v63 = vpop.f32.mrf.mxu0  ;;  %v364_v3 = vpop.f32.mrf.mxu1 }
  0xe3   : > { %606 = vpow2.f32 %v410_v56  ;;  %v398_v0 = vsub.f32 0.0, %v382_v57  ;;  %v380_v1 = vmax.f32 %v330_v58, 0.0  ;;  %v341_v2 = vadd.f32 %v563_v55, %v685_v10 }
  0xe4   : > { %608 = vpow2.f32 %v426_v60  ;;  %v406_v4 = vsub.f32 0.0, %v390_v61  ;;  %v388_v5 = vmax.f32 %v362_v62, 0.0  ;;  %v373_v6 = vadd.f32 %v571_v59, %v685_v10 }
  0xe5   : > { %v420_v7 = vmul.f32 1.442695, %v398_v0  ;;  %v396_v8 = vsub.f32 0.0, %v380_v1  ;;  %v383_v9 = vmax.f32 %v341_v2, 0.0  ;;  %v333_v11 = vadd.f32 %v685_v10, %v332_v63 }
  0xe6   : > { %v436_v12 = vmul.f32 1.442695, %v406_v4  ;;  %v404_v13 = vsub.f32 0.0, %v388_v5  ;;  %v391_v14 = vmax.f32 %v373_v6, 0.0  ;;  %v365_v15 = vadd.f32 %v685_v10, %v364_v3 }
  0xe7   : > { %610 = vpow2.f32 %v420_v7  ;;  %v416_v16 = vmul.f32 1.442695, %v396_v8  ;;  %v399_v17 = vsub.f32 0.0, %v383_v9  ;;  %v381_v18 = vmax.f32 %v333_v11, 0.0 }
  0xe8   : > { %612 = vpow2.f32 %v436_v12  ;;  %v432_v19 = vmul.f32 1.442695, %v404_v13  ;;  %v407_v20 = vsub.f32 0.0, %v391_v14  ;;  %v389_v21 = vmax.f32 %v365_v15, 0.0 }
  0xe9   : > { %614 = vpow2.f32 %v416_v16  ;;  %v422_v22 = vmul.f32 1.442695, %v399_v17  ;;  %v397_v23 = vsub.f32 0.0, %v381_v18 }
  0xea   : > { %v595_v10 = vpop.eup %594  ;;  %616 = vpow2.f32 %v432_v19  ;;  %v438_v24 = vmul.f32 1.442695, %v407_v20  ;;  %v405_v25 = vsub.f32 0.0, %v389_v21 }
  0xeb   : > { %v597_v26 = vpop.eup %596  ;;  %442 = vst.msk [vmem:[%s707_s28 + $0x10] sm:$0xff] %vm254_vm0, %v595_v10  ;;  %618 = vpow2.f32 %v422_v22  ;;  %v418_v27 = vmul.f32 1.442695, %v397_v23 }
  0xec   : > { %v599_v28 = vpop.eup %598  ;;  %450 = vst.msk [vmem:[%s707_s28 + $0x50] sm:$0xff] %vm254_vm0, %v597_v26  ;;  %620 = vpow2.f32 %v438_v24  ;;  %v434_v29 = vmul.f32 1.442695, %v405_v25 }
  0xed   : > { %v601_v30 = vpop.eup %600  ;;  %440 = vst.msk [vmem:[%s707_s28] sm:$0xff] %vm254_vm0, %v599_v28  ;;  %622 = vpow2.f32 %v418_v27 }
  0xee   : > { %v603_v31 = vpop.eup %602  ;;  %448 = vst.msk [vmem:[%s707_s28 + $0x40] sm:$0xff] %vm254_vm0, %v601_v30  ;;  %624 = vpow2.f32 %v434_v29 }
  0xef   : > { %v605_v32 = vpop.eup %604  ;;  %443 = vst.msk [vmem:[%s707_s28 + $0x18] sm:$0xff] %vm254_vm0, %v603_v31 }
  0xf0   : > { %v607_v33 = vpop.eup %606  ;;  %451 = vst.msk [vmem:[%s707_s28 + $0x58] sm:$0xff] %vm254_vm0, %v605_v32 }
  0xf1   : > { %v609_v34 = vpop.eup %608  ;;  %441 = vst.msk [vmem:[%s707_s28 + $0x8] sm:$0xff] %vm254_vm0, %v607_v33 }
  0xf2   : > { %449 = vst.msk [vmem:[%s707_s28 + $0x48] sm:$0xff] %vm254_vm0, %v609_v34 }
  0xf4   : > { %v611_v35 = vpop.eup %610 }
  0xf5   : > { %v613_v36 = vpop.eup %612  ;;  %446 = vst.msk [vmem:[%s707_s28 + $0x30] sm:$0xff] %vm254_vm0, %v611_v35 }
  0xf6   : > { %v615_v37 = vpop.eup %614  ;;  %454 = vst.msk [vmem:[%s707_s28 + $0x70] sm:$0xff] %vm254_vm0, %v613_v36 }
  0xf7   : > { %v617_v38 = vpop.eup %616  ;;  %444 = vst.msk [vmem:[%s707_s28 + $0x20] sm:$0xff] %vm254_vm0, %v615_v37 }
  0xf8   : > { %v619_v39 = vpop.eup %618  ;;  %452 = vst.msk [vmem:[%s707_s28 + $0x60] sm:$0xff] %vm254_vm0, %v617_v38 }
  0xf9   : > { %v621_v40 = vpop.eup %620  ;;  %447 = vst.msk [vmem:[%s707_s28 + $0x38] sm:$0xff] %vm254_vm0, %v619_v39 }
  0xfa   : > { %v623_v41 = vpop.eup %622  ;;  %455 = vst.msk [vmem:[%s707_s28 + $0x78] sm:$0xff] %vm254_vm0, %v621_v40 }
  0xfb   : > { %v625_v42 = vpop.eup %624  ;;  %445 = vst.msk [vmem:[%s707_s28 + $0x28] sm:$0xff] %vm254_vm0, %v623_v41 }
  0xfc   : > { %453 = vst.msk [vmem:[%s707_s28 + $0x68] sm:$0xff] %vm254_vm0, %v625_v42 }
  0xfd PF: > { %s13_s12 = sadd.s32 1, %s632_s12  }
  0xfe   : > { %p10_p4 = scmp.ge.s32.totalorder %s13_s12, 4  }
 0x100   :  { %12 = sbr.rel (!%p10_p4) target bundleno = 1 (0x1), region = 62 }

</bundles_post_ra>
